<compile_context>
chip_gen: v5e
topology: v5e:2x2
jax: 0.10.0
libtpu: 0.0.40
codegen_flags: <defaults>
</compile_context>

<pallas_src>
import math
import functools

import jax
import jax.numpy as jnp
from jax.experimental import pallas as pl
from jax.experimental.pallas import tpu as pltpu

_INV_SQRT2 = 1.0 / math.sqrt(2.0)
_SMALL_INPUT_ELEMS = 64 * 1024          # below this, skip pallas_call entirely
_TARGET_BLOCK_BYTES = 4 * 1024 * 1024   # ~4 MiB/block -> near HBM roofline
_MIN_TC_BLOCK_BYTES = 2 * 1024 * 1024   # floor per-TensorCore block for v7x split


def _round_up(a, m):
    return -(-a // m) * m


def _sublane_multiple(dtype):
    itemsize = jnp.dtype(dtype).itemsize
    if itemsize >= 4:
        return 8
    if itemsize == 2:
        return 16
    return 32


def _erf_via_exp(z):
    """erf(z) via the Numerical-Recipes erfc form: erfc(|z|) = t*exp(-z^2+poly(t)).

    Fractional error < 1.2e-7. The heavy transcendental is a single jnp.exp,
    which lowers to the EUP (its own bundle slot), leaving the VALU slot for
    the short polynomial — unlike jax.lax.erf's VALU-only rational polynomial.
    """
    az = jnp.abs(z)
    t = 1.0 / (1.0 + 0.5 * az)
    poly = -1.26551223 + t * (1.00002368 + t * (0.37409196 + t * (0.09678418 +
           t * (-0.18628806 + t * (0.27886807 + t * (-1.13520398 + t * (
           1.48851587 + t * (-0.82215223 + t * 0.17087277))))))))
    erfc_az = t * jnp.exp(-az * az + poly)
    return jnp.where(z >= 0, 1.0 - erfc_az, erfc_az - 1.0)


def _clipped_gelu_math(x, min_val, max_val):
    """Pure-jnp reference / small-input & tail fast path (uses exact lax.erf)."""
    xf = x.astype(jnp.float32)
    g = 0.5 * xf * (1.0 + jax.lax.erf(xf * _INV_SQRT2))
    g = g.astype(x.dtype)
    return jnp.clip(g, jnp.asarray(min_val, x.dtype), jnp.asarray(max_val, x.dtype))


def _clipped_gelu_kernel(x_ref, o_ref, *, min_val, max_val):
    xf = x_ref[...].astype(jnp.float32)
    # Exact (erf-based) GELU semantics, erf evaluated via the EUP-friendly
    # exp form above. bf16 inputs are computed in f32 (may differ from
    # torch's in-dtype compute by ~1 ulp of bf16).
    g = 0.5 * xf * (1.0 + _erf_via_exp(xf * _INV_SQRT2))
    # Downcast first, then clip in the output dtype so bounds that are not
    # exactly representable cannot round back outside [min, max] (torch clips
    # in the input dtype).
    g = g.astype(o_ref.dtype)
    o_ref[...] = jnp.clip(g,
                          jnp.asarray(min_val, o_ref.dtype),
                          jnp.asarray(max_val, o_ref.dtype))


def _choose_slab(n):
    """Pick (rows, lanes) for a zero-copy lane-dense 2D view of n elements."""
    for lanes in (1024, 512, 256, 128):
        if n % lanes == 0:
            return n // lanes, lanes
    return None


def _run_pallas_2d(x2d, min_val, max_val):
    rows, lanes = x2d.shape
    itemsize = jnp.dtype(x2d.dtype).itemsize
    sub = _sublane_multiple(x2d.dtype)

    # ~4 MiB block; rows per block a multiple of the native sublane packing.
    tr = max(sub, (_TARGET_BLOCK_BYTES // (lanes * itemsize)) // sub * sub)

    # v7x megacore: allow the "parallel" axis to split across the 2 TCs, but
    # only when each TC still gets a >= ~2 MiB block. No forced >=8-step grid:
    # one roofline-sized DMA per core beats many tiny ones on every generation.
    slab_bytes = rows * lanes * itemsize
    if slab_bytes >= 2 * _MIN_TC_BLOCK_BYTES:
        tr = min(tr, _round_up(pl.cdiv(rows, 2), sub))

    if tr >= rows:
        tr = rows   # single full-extent block (legal for any row count)
    grid = (pl.cdiv(rows, tr),)   # trailing block may be partial (masked)

    kernel = functools.partial(
        _clipped_gelu_kernel, min_val=float(min_val), max_val=float(max_val)
    )
    # TODO(synk): if 2-4 step grids ever expose DMA start latency on v7x, add
    # pipeline_mode=pl.Buffered(3) on the input BlockSpec only.
    return pl.pallas_call(
        kernel,
        out_shape=jax.ShapeDtypeStruct((rows, lanes), x2d.dtype),
        grid_spec=pltpu.PrefetchScalarGridSpec(
            num_scalar_prefetch=0,
            grid=grid,
            in_specs=[pl.BlockSpec((tr, lanes), lambda i: (i, 0))],
            out_specs=pl.BlockSpec((tr, lanes), lambda i: (i, 0)),
        ),
        compiler_params=pltpu.CompilerParams(
            dimension_semantics=("parallel",),
            # 4 MiB blocks x (in + out) x double-buffer = 16 MiB: exceeds the
            # v5e scoped default (16 MiB), so raise the limit.
            vmem_limit_bytes=32 * 1024 * 1024,
        ),
    )(x2d)


def clipped_gelu(x, *, min_val: float, max_val: float, force_pallas: bool = False):
    """clip(gelu(x), min_val, max_val) elementwise, via a Pallas TPU kernel."""
    if min_val > max_val:
        raise ValueError(f"min should be < max (got min: {min_val}, max: {max_val})")

    orig_shape = x.shape
    n = x.size
    if n == 0:
        return x

    # Small-input fast path: launch + pipeline warm-up would dominate.
    if not force_pallas and n < _SMALL_INPUT_ELEMS:
        return _clipped_gelu_math(x, min_val, max_val)

    x_flat = x.reshape(-1)
    slab = _choose_slab(n)
    if slab is not None:
        rows, lanes = slab
        out2d = _run_pallas_2d(x_flat.reshape(rows, lanes), min_val, max_val)
        return out2d.reshape(orig_shape)

    # n % 128 != 0 (rare for ML shapes): kernel over the 128-aligned prefix,
    # jnp for the <128-element tail. Avoids full-array pad + slice passes.
    prefix = (n // 128) * 128
    if prefix == 0:
        return _clipped_gelu_math(x, min_val, max_val)
    rows, lanes = _choose_slab(prefix)
    head = _run_pallas_2d(
        x_flat[:prefix].reshape(rows, lanes), min_val, max_val
    ).reshape(-1)
    tail = _clipped_gelu_math(x_flat[prefix:], min_val, max_val)
    return jnp.concatenate([head, tail]).reshape(orig_shape)


class ClippedGELUActivationPallas:
    """JAX/Pallas equivalent of the PyTorch ClippedGELUActivation module."""

    def __init__(self, min: float, max: float):
        if min > max:
            raise ValueError(f"min should be < max (got min: {min}, max: {max})")
        self.min = min
        self.max = max

    def __call__(self, x):
        return clipped_gelu(x, min_val=self.min, max_val=self.max)


if __name__ == "__main__":
    act = ClippedGELUActivationPallas(min=-10.0, max=10.0)   # 'gelu_10' config

    def _ref(x, lo, hi):
        xf = x.astype(jnp.float32)
        g = 0.5 * xf * (1.0 + jax.lax.erf(xf * _INV_SQRT2))
        g = g.astype(x.dtype)
        return jnp.clip(g, jnp.asarray(lo, x.dtype), jnp.asarray(hi, x.dtype))

    # Small NCHW input per the module spec; force the Pallas path so the
    # kernel is actually exercised (the wrapper would otherwise use the
    # small-input jnp fast path).
    x_small = jax.random.normal(jax.random.PRNGKey(0), (2, 4, 16, 16),
                                dtype=jnp.float32) * 5.0
    out_small = jax.block_until_ready(
        clipped_gelu(x_small, min_val=-10.0, max_val=10.0, force_pallas=True))
    assert out_small.shape == x_small.shape and out_small.dtype == x_small.dtype
    assert jnp.allclose(out_small, _ref(x_small, -10.0, 10.0), atol=1e-5, rtol=1e-5)

    # Relaxed-slab path: n % 128 == 0 but rows not a multiple of 8.
    x_odd = jax.random.normal(jax.random.PRNGKey(1), (2, 4, 16, 17),
                              dtype=jnp.float32) * 5.0
    out_odd = jax.block_until_ready(
        clipped_gelu(x_odd, min_val=-10.0, max_val=10.0, force_pallas=True))
    assert jnp.allclose(out_odd, _ref(x_odd, -10.0, 10.0), atol=1e-5, rtol=1e-5)

    # Medium input: multi-step grid with a partial trailing block and the
    # v7x 2-way megacore split path (10 MiB f32 slab, tr = 1024, grid = 3).
    x_big = jax.random.normal(jax.random.PRNGKey(2), (5, 8, 64, 1024),
                              dtype=jnp.float32) * 5.0
    out_big = jax.block_until_ready(act(x_big))
    assert out_big.shape == x_big.shape and out_big.dtype == x_big.dtype
    assert jnp.allclose(out_big, _ref(x_big, -10.0, 10.0), atol=1e-5, rtol=1e-5)

    # bf16 input exercising the 16-row sublane packing + in-dtype clipping.
    x_bf16 = (jax.random.normal(jax.random.PRNGKey(3), (4, 8, 64, 128)) * 5.0
              ).astype(jnp.bfloat16)
    out_bf16 = jax.block_until_ready(
        clipped_gelu(x_bf16, min_val=-10.0, max_val=10.0, force_pallas=True))
    assert out_bf16.dtype == jnp.bfloat16
    assert jnp.allclose(out_bf16.astype(jnp.float32),
                        _ref(x_bf16, -10.0, 10.0).astype(jnp.float32),
                        atol=0.1, rtol=0.05)

    print("KERNEL_OK")
</pallas_src>

<mosaic_0001>
module attributes {stable_mosaic.version = 11 : i64} {
  func.func @_clipped_gelu_kernel(%arg0: i32, %arg1: memref<2x1024xf32, #tpu.memory_space<vmem>>, %arg2: memref<2x1024xf32, #tpu.memory_space<vmem>>) attributes {dimension_semantics = [#tpu.dimension_semantics<parallel>], iteration_bounds = array<i64: 1>, scalar_prefetch = 0 : i64, scratch_operands = 0 : i64, tpu.core_type = #tpu.core_type<tc>, window_params = [{transform_indices = @transform_0, window_bounds = array<i64: 2, 1024>}, {transform_indices = @transform_1, window_bounds = array<i64: 2, 1024>}]} {
    %c0 = arith.constant 0 : index
    %c0_0 = arith.constant 0 : index
    %0 = vector.load %arg1[%c0, %c0_0] : memref<2x1024xf32, #tpu.memory_space<vmem>>, vector<2x1024xf32>
    %cst = arith.constant 5.000000e-01 : f32
    %1 = vector.broadcast %cst : f32 to vector<2x1024xf32>
    %2 = arith.mulf %1, %0 : vector<2x1024xf32>
    %cst_1 = arith.constant 0.707106769 : f32
    %3 = vector.broadcast %cst_1 : f32 to vector<2x1024xf32>
    %4 = arith.mulf %0, %3 : vector<2x1024xf32>
    %5 = math.absf %4 : vector<2x1024xf32>
    %cst_2 = arith.constant 5.000000e-01 : f32
    %6 = vector.broadcast %cst_2 : f32 to vector<2x1024xf32>
    %7 = arith.mulf %6, %5 : vector<2x1024xf32>
    %cst_3 = arith.constant 1.000000e+00 : f32
    %8 = vector.broadcast %cst_3 : f32 to vector<2x1024xf32>
    %9 = arith.addf %8, %7 : vector<2x1024xf32>
    %cst_4 = arith.constant 1.000000e+00 : f32
    %10 = vector.broadcast %cst_4 : f32 to vector<2x1024xf32>
    %11 = arith.divf %10, %9 : vector<2x1024xf32>
    %cst_5 = arith.constant 0.170872763 : f32
    %12 = vector.broadcast %cst_5 : f32 to vector<2x1024xf32>
    %13 = arith.mulf %11, %12 : vector<2x1024xf32>
    %cst_6 = arith.constant -0.822152256 : f32
    %14 = vector.broadcast %cst_6 : f32 to vector<2x1024xf32>
    %15 = arith.addf %14, %13 : vector<2x1024xf32>
    %16 = arith.mulf %11, %15 : vector<2x1024xf32>
    %cst_7 = arith.constant 1.48851585 : f32
    %17 = vector.broadcast %cst_7 : f32 to vector<2x1024xf32>
    %18 = arith.addf %17, %16 : vector<2x1024xf32>
    %19 = arith.mulf %11, %18 : vector<2x1024xf32>
    %cst_8 = arith.constant -1.13520396 : f32
    %20 = vector.broadcast %cst_8 : f32 to vector<2x1024xf32>
    %21 = arith.addf %20, %19 : vector<2x1024xf32>
    %22 = arith.mulf %11, %21 : vector<2x1024xf32>
    %cst_9 = arith.constant 0.278868079 : f32
    %23 = vector.broadcast %cst_9 : f32 to vector<2x1024xf32>
    %24 = arith.addf %23, %22 : vector<2x1024xf32>
    %25 = arith.mulf %11, %24 : vector<2x1024xf32>
    %cst_10 = arith.constant -0.186288059 : f32
    %26 = vector.broadcast %cst_10 : f32 to vector<2x1024xf32>
    %27 = arith.addf %26, %25 : vector<2x1024xf32>
    %28 = arith.mulf %11, %27 : vector<2x1024xf32>
    %cst_11 = arith.constant 0.0967841818 : f32
    %29 = vector.broadcast %cst_11 : f32 to vector<2x1024xf32>
    %30 = arith.addf %29, %28 : vector<2x1024xf32>
    %31 = arith.mulf %11, %30 : vector<2x1024xf32>
    %cst_12 = arith.constant 0.374091953 : f32
    %32 = vector.broadcast %cst_12 : f32 to vector<2x1024xf32>
    %33 = arith.addf %32, %31 : vector<2x1024xf32>
    %34 = arith.mulf %11, %33 : vector<2x1024xf32>
    %cst_13 = arith.constant 1.00002372 : f32
    %35 = vector.broadcast %cst_13 : f32 to vector<2x1024xf32>
    %36 = arith.addf %35, %34 : vector<2x1024xf32>
    %37 = arith.mulf %11, %36 : vector<2x1024xf32>
    %cst_14 = arith.constant -1.26551223 : f32
    %38 = vector.broadcast %cst_14 : f32 to vector<2x1024xf32>
    %39 = arith.addf %38, %37 : vector<2x1024xf32>
    %cst_15 = arith.constant 0.000000e+00 : f32
    %40 = vector.broadcast %cst_15 : f32 to vector<2x1024xf32>
    %41 = arith.subf %40, %5 : vector<2x1024xf32>
    %42 = arith.mulf %41, %5 : vector<2x1024xf32>
    %43 = arith.addf %42, %39 : vector<2x1024xf32>
    %44 = math.exp %43 : vector<2x1024xf32>
    %45 = arith.mulf %11, %44 : vector<2x1024xf32>
    %cst_16 = arith.constant 0.000000e+00 : f32
    %46 = vector.broadcast %cst_16 : f32 to vector<2x1024xf32>
    %47 = arith.cmpf oge, %4, %46 : vector<2x1024xf32>
    %cst_17 = arith.constant 1.000000e+00 : f32
    %48 = vector.broadcast %cst_17 : f32 to vector<2x1024xf32>
    %49 = arith.subf %48, %45 : vector<2x1024xf32>
    %cst_18 = arith.constant 1.000000e+00 : f32
    %50 = vector.broadcast %cst_18 : f32 to vector<2x1024xf32>
    %51 = arith.subf %45, %50 : vector<2x1024xf32>
    %52 = arith.select %47, %49, %51 : vector<2x1024xi1>, vector<2x1024xf32>
    %cst_19 = arith.constant 1.000000e+00 : f32
    %53 = vector.broadcast %cst_19 : f32 to vector<2x1024xf32>
    %54 = arith.addf %53, %52 : vector<2x1024xf32>
    %55 = arith.mulf %2, %54 : vector<2x1024xf32>
    %cst_20 = arith.constant -1.000000e+01 : f32
    %cst_21 = arith.constant 1.000000e+01 : f32
    %56 = vector.broadcast %cst_20 : f32 to vector<2x1024xf32>
    %57 = arith.maximumf %56, %55 : vector<2x1024xf32>
    %58 = vector.broadcast %cst_21 : f32 to vector<2x1024xf32>
    %59 = arith.minimumf %58, %57 : vector<2x1024xf32>
    %c0_22 = arith.constant 0 : index
    %c0_23 = arith.constant 0 : index
    %60 = vector.load %arg2[%c0_22, %c0_23] : memref<2x1024xf32, #tpu.memory_space<vmem>>, vector<2x1024xf32>
    tpu.vector_store %arg2[%c0_22, %c0_23], %59 {strides = array<i32>} : memref<2x1024xf32, #tpu.memory_space<vmem>>, vector<2x1024xf32>,
    return
  }
  func.func @transform_0(%arg0: i32) -> (i32, i32) {
    %c0_i32 = arith.constant 0 : i32
    %c0_i32_0 = arith.constant 0 : i32
    return %arg0, %c0_i32 : i32, i32
  }
  func.func @transform_1(%arg0: i32) -> (i32, i32) {
    %c0_i32 = arith.constant 0 : i32
    %c0_i32_0 = arith.constant 0 : i32
    return %arg0, %c0_i32 : i32, i32
  }
}

</mosaic_0001>

<bundles_post_ra>
// kernel: tpu_custom_call.1
= control target key start
LH: loop header
LB: loop body
LE: loop exit
PB: predicated region body
PF: predicated region fallthrough
CT: control target
= control target key end

     0   :  { %6 = vsyncpa [#allocation3], 0  ;;  %s258_s0 = inlined_call_operand.hbm [shape: f32[2,1024], index: 0, kind: input, shape index: {}]   ;;  %s259_s1 = inlined_call_operand.hbm [shape: f32[2,1024], index: 1, kind: output, shape index: {}]  }
   0x1   :  { %7 = vsyncpa [#allocation4], 0  ;;  %s13_s8 = sshll.u32 %s258_s0, 4  ;;  %s214_s9 = smov [#allocation2]   ;;  %s14_s8 = int_to_ptr.hbm [resolvable:$true] %s13_s8 }
   0x2   :  { %s15_s10 = sshll.u32 %s214_s9, 4  ;;  %s16_s10 = int_to_ptr.vmem [resolvable:$true] %s15_s10 }
   0x3   :  { %18 = dma.hbm_to_vmem [thread:$0]  %s14_s8, 256, %s16_s10, [#allocation3]  }
   0x4   :  { %210 = dma.done.wait [#allocation3], 256  }
   0x5   :  { %211 = vsyncadd [#allocation3], 4294967040  ;;  %v229_v0 = vld [vmem:[#allocation2] sm:$0xff]  ;;  %v231_v1 = vld [vmem:[#allocation2 + $0x8] sm:$0xff]  ;;  %s215_s0 = smov [#allocation5]   ;;  %s138_s14 = sshll.u32 %s259_s1, 4  ;;  %s139_s14 = int_to_ptr.hbm [resolvable:$true] %s138_s14 }
   0x6   :  { %v234_v2 = vmul.f32 0.70710677, %v229_v0  ;;  %v237_v3 = vmul.f32 0.70710677, %v231_v1  ;;  %s136_s11 = sshll.u32 %s215_s0, 4  ;;  %s137_s11 = int_to_ptr.vmem [resolvable:$true] %s136_s11 }
   0x8   :  { %v240_v4 = vand.u32 2147483647, %v234_v2  ;;  %v243_v5 = vand.u32 2147483647, %v237_v3  ;;  %vm113_vm8 = vcmp.ge.f32.partialorder %v234_v2, 0.0  ;;  %vm114_vm9 = vcmp.ge.f32.partialorder %v237_v3, 0.0 }
   0xa   :  { %v31_v6 = vmul.f32 0.5, %v240_v4  ;;  %v32_v7 = vmul.f32 0.5, %v243_v5  ;;  %v101_v59 = vsub.f32 0.0, %v240_v4  ;;  %v102_v61 = vsub.f32 0.0, %v243_v5 }
   0xc   :  { %v33_v8 = vadd.f32 1.0, %v31_v6  ;;  %v34_v9 = vadd.f32 1.0, %v32_v7  ;;  %v103_v7 = vmul.f32 %v101_v59, %v240_v4  ;;  %v25_v4 = vmul.f32 0.5, %v229_v0 }
   0xe   :  { %154 = vrcp.f32 %v33_v8  ;;  %vm40_vm0 = vweird.f32 %v33_v8  ;;  %v46_v13 = vand.u32 2147483648, %v33_v8  ;;  %v44_v16 = vand.u32 2147483647, %v33_v8 }
   0xf   :  { %156 = vrcp.f32 %v34_v9  ;;  %v61_v17 = vand.u32 2147483648, %v34_v9  ;;  %vm55_vm2 = vweird.f32 %v34_v9  ;;  %v59_v19 = vand.u32 2147483647, %v34_v9 }
  0x10   :  { %v47_v21 = vor.u32 1.1754944e-38, %v46_v13  ;;  %vm45_vm5 = vcmp.eq.f32.partialorder %v44_v16, 8.507059e+37 }
  0x11   :  { %v62_v24 = vor.u32 1.1754944e-38, %v61_v17  ;;  %vm60_vm7 = vcmp.eq.f32.partialorder %v59_v19, 8.507059e+37 }
  0x14   :  { %v155_v10 = vpop.eup %154 }
  0x15   :  { %v157_v11 = vpop.eup %156  ;;  %v36_v12 = vmul.f32 %v155_v10, %v33_v8  ;;  %vm41_vm1 = vweird.f32 %v155_v10 }
  0x16   :  { %v51_v14 = vmul.f32 %v157_v11, %v34_v9  ;;  %vm56_vm3 = vweird.f32 %v157_v11  ;;  %vm42_vm4 = vmor %vm40_vm0, %vm41_vm1  ;;  %v104_v9 = vmul.f32 %v102_v61, %v243_v5 }
  0x17   :  { %v37_v15 = vsub.f32 1.0, %v36_v12  ;;  %vm57_vm6 = vmor %vm55_vm2, %vm56_vm3 }
  0x18   :  { %v52_v18 = vsub.f32 1.0, %v51_v14 }
  0x19   :  { %v38_v20 = vmul.f32 %v155_v10, %v37_v15 }
  0x1a   :  { %v53_v22 = vmul.f32 %v157_v11, %v52_v18 }
  0x1b   :  { %v39_v23 = vadd.f32 %v155_v10, %v38_v20 }
  0x1c   :  { %v54_v25 = vadd.f32 %v157_v11, %v53_v22 }
  0x1d   :  { %v43_v26 = vsel %vm42_vm4, %v155_v10, %v39_v23 }
  0x1e   :  { %v48_v27 = vsel %vm45_vm5, %v47_v21, %v43_v26  ;;  %v58_v28 = vsel %vm57_vm6, %v157_v11, %v54_v25 }
  0x1f   :  { %v65_v29 = vmul.f32 0.17087276, %v48_v27  ;;  %v63_v30 = vsel %vm60_vm7, %v62_v24, %v58_v28  ;;  %v26_v24 = vmul.f32 0.5, %v231_v1 }
  0x20   :  { %v66_v31 = vmul.f32 0.17087276, %v63_v30 }
  0x21   :  { %v67_v32 = vadd.f32 -0.82215226, %v65_v29 }
  0x22   :  { %v68_v33 = vadd.f32 -0.82215226, %v66_v31 }
  0x23   :  { %v69_v34 = vmul.f32 %v67_v32, %v48_v27 }
  0x24   :  { %v70_v35 = vmul.f32 %v68_v33, %v63_v30 }
  0x25   :  { %v71_v36 = vadd.f32 1.4885159, %v69_v34 }
  0x26   :  { %v72_v37 = vadd.f32 1.4885159, %v70_v35 }
  0x27   :  { %v73_v38 = vmul.f32 %v71_v36, %v48_v27 }
  0x28   :  { %v74_v39 = vmul.f32 %v72_v37, %v63_v30 }
  0x29   :  { %v75_v40 = vadd.f32 -1.135204, %v73_v38 }
  0x2a   :  { %v76_v41 = vadd.f32 -1.135204, %v74_v39 }
  0x2b   :  { %v77_v42 = vmul.f32 %v75_v40, %v48_v27 }
  0x2c   :  { %v78_v43 = vmul.f32 %v76_v41, %v63_v30 }
  0x2d   :  { %v79_v44 = vadd.f32 0.27886808, %v77_v42 }
  0x2e   :  { %v80_v45 = vadd.f32 0.27886808, %v78_v43 }
  0x2f   :  { %v81_v46 = vmul.f32 %v79_v44, %v48_v27 }
  0x30   :  { %v82_v47 = vmul.f32 %v80_v45, %v63_v30 }
  0x31   :  { %v83_v48 = vadd.f32 -0.18628806, %v81_v46 }
  0x32   :  { %v84_v49 = vadd.f32 -0.18628806, %v82_v47 }
  0x33   :  { %v85_v50 = vmul.f32 %v83_v48, %v48_v27 }
  0x34   :  { %v86_v51 = vmul.f32 %v84_v49, %v63_v30 }
  0x35   :  { %v87_v52 = vadd.f32 0.09678418, %v85_v50 }
  0x36   :  { %v88_v53 = vadd.f32 0.09678418, %v86_v51 }
  0x37   :  { %v89_v54 = vmul.f32 %v87_v52, %v48_v27 }
  0x38   :  { %v90_v55 = vmul.f32 %v88_v53, %v63_v30 }
  0x39   :  { %v91_v56 = vadd.f32 0.37409195, %v89_v54 }
  0x3a   :  { %v92_v57 = vadd.f32 0.37409195, %v90_v55 }
  0x3b   :  { %v93_v58 = vmul.f32 %v91_v56, %v48_v27 }
  0x3c   :  { %v94_v60 = vmul.f32 %v92_v57, %v63_v30 }
  0x3d   :  { %v95_v62 = vadd.f32 1.0000237, %v93_v58 }
  0x3e   :  { %v96_v63 = vadd.f32 1.0000237, %v94_v60 }
  0x3f   :  { %v97_v6 = vmul.f32 %v95_v62, %v48_v27 }
  0x40   :  { %v98_v8 = vmul.f32 %v96_v63, %v63_v30 }
  0x41   :  { %v99_v10 = vadd.f32 -1.2655122, %v97_v6 }
  0x42   :  { %v100_v11 = vadd.f32 -1.2655122, %v98_v8 }
  0x43   :  { %v105_v12 = vadd.f32 %v103_v7, %v99_v10 }
  0x44   :  { %v106_v13 = vadd.f32 %v104_v9, %v100_v11 }
  0x45   :  { %v107_v14 = vmul.f32 1.442695, %v105_v12 }
  0x46   :  { %v109_v15 = vmul.f32 1.442695, %v106_v13 }
  0x47   :  { %158 = vpow2.f32 %v107_v14 }
  0x48   :  { %160 = vpow2.f32 %v109_v15 }
  0x4d   :  { %v159_v16 = vpop.eup %158 }
  0x4e   :  { %v161_v17 = vpop.eup %160  ;;  %v111_v18 = vmul.f32 %v159_v16, %v48_v27 }
  0x4f   :  { %v112_v19 = vmul.f32 %v161_v17, %v63_v30 }
  0x50   :  { %v115_v20 = vsub.f32 1.0, %v111_v18  ;;  %v148_v21 = vadd.f32 -1.0, %v111_v18 }
  0x51   :  { %v116_v5 = vsub.f32 1.0, %v112_v19  ;;  %v149_v22 = vadd.f32 -1.0, %v112_v19 }
  0x52   :  { %v119_v23 = vsel %vm113_vm8, %v115_v20, %v148_v21 }
  0x53   :  { %v121_v25 = vadd.f32 1.0, %v119_v23  ;;  %v120_v26 = vsel %vm114_vm9, %v116_v5, %v149_v22 }
  0x54   :  { %v122_v28 = vadd.f32 1.0, %v120_v26 }
  0x55   :  { %v123_v29 = vmul.f32 %v121_v25, %v25_v4 }
  0x56   :  { %v124_v2 = vmul.f32 %v122_v28, %v26_v24 }
  0x57   :  { %v150_v27 = vclamps-f32 %v123_v29, 10.0 }
  0x58   :  { %v151_v3 = vclamps-f32 %v124_v2, 10.0 }
  0x59   :  { %129 = vst [vmem:[#allocation5] sm:$0xff] %v150_v27 }
  0x5a   :  { %130 = vst [vmem:[#allocation5 + $0x8] sm:$0xff] %v151_v3 }
  0x5b   :  { %141 = dma.vmem_to_hbm [thread:$0]  %s137_s11, 256, %s139_s14, [#allocation4]  }
  0x5c   :  { %212 = dma.done.wait [#allocation4], 256  }
  0x5d   :  { %213 = vsyncadd [#allocation4], 4294967040 }
  0x5e   :  { %146 = vsyncpa [#allocation3], 1 }
  0x5f   :  { %147 = vsyncpa [#allocation4], 1 }

</bundles_post_ra>
